<compile_context>
chip_gen: v6e
topology: v6e:2x2x1
jax: 0.10.0
libtpu: 0.0.40
codegen_flags: <defaults>
</compile_context>

<pallas_src>
import jax
import jax.numpy as jnp
from jax.experimental import pallas as pl
from jax.experimental.pallas import tpu as pltpu

_MASK = -1e30  # masked-column logit; exp() underflows to exactly 0 in f32


def _round_up(x, m):
    return ((x + m - 1) // m) * m


def _cdiv(a, b):
    return (a + b - 1) // b


def _vmem_capacity_bytes():
    try:
        return int(pltpu.get_tpu_info().vmem_capacity_bytes)
    except Exception:
        return 64 * 1024 * 1024  # conservative: v7x per-TensorCore VMEM


def _make_kernel(v_total, tv, nj):
    """v_total: true vocab size; tv: vocab tile; nj: number of vocab tiles."""
    ragged = (v_total % tv) != 0

    def kernel(x_ref, w_ref, b_ref, o_ref, logits_sc, m_sc, l_sc):
        # Grid: (i row tiles [parallel], p pass 0/1 [arbitrary], j vocab tiles [arbitrary])
        #   pass 0: logits tile -> scratch, online max / sum-exp accumulation
        #   pass 1: read scratch, subtract logsumexp, write output tile
        p = pl.program_id(1)
        j = pl.program_id(2)

        @pl.when(jnp.logical_and(p == 0, j == 0))
        def _():
            m_sc[...] = jnp.full_like(m_sc, -jnp.inf)
            l_sc[...] = jnp.zeros_like(l_sc)

        @pl.when(p == 0)
        def _():
            # bf16 (or f32) operands, f32 MXU accumulation; softmax math in f32.
            logits = jnp.dot(x_ref[...], w_ref[...],
                             preferred_element_type=jnp.float32) + b_ref[...]
            if ragged:
                # Mask vocab columns >= v_total (only the last tile is ragged;
                # the where is cheap VPU work hidden under the MXU/DMA).
                col = j * tv + jax.lax.broadcasted_iota(jnp.int32, logits.shape, 1)
                logits = jnp.where(col < v_total, logits, _MASK)
            logits_sc[j] = logits
            m_prev = m_sc[...]
            m_new = jnp.maximum(m_prev, jnp.max(logits, axis=-1, keepdims=True))
            l_sc[...] = (l_sc[...] * jnp.exp(m_prev - m_new)
                         + jnp.sum(jnp.exp(logits - m_new), axis=-1, keepdims=True))
            m_sc[...] = m_new

        @pl.when(jnp.logical_and(p == 1, j == 0))
        def _():
            # Finalize logsumexp once per row tile; reused for all vocab tiles.
            m_sc[...] = m_sc[...] + jnp.log(l_sc[...])

        @pl.when(p == 1)
        def _():
            o_ref[...] = (logits_sc[j] - m_sc[...]).astype(o_ref.dtype)

    return kernel


def projection_layer(x, w, b, *, tm=512, tv=512,
                     compute_dtype=jnp.bfloat16, out_dtype=jnp.float32):
    """x: (B, S, D), w: (D, V), b: (V,)  ->  (B, S, V) log-probs in out_dtype."""
    B, S, D = x.shape
    Dw, V = w.shape
    assert D == Dw and b.shape == (V,)
    M = B * S

    # Cast matmul operands straight to the compute dtype (no f32 round-trip).
    # Callers that reuse the weight should pre-cast it once to compute_dtype so
    # the (D, V) cast copy is not paid on every call.
    xc = x.reshape(M, D).astype(compute_dtype)
    wc = w.astype(compute_dtype)
    b2 = b.reshape(1, V).astype(jnp.float32)

    cd = jnp.dtype(compute_dtype).itemsize
    od = jnp.dtype(out_dtype).itemsize
    sub = {4: 8, 2: 16, 1: 32}[cd]          # sublane multiple for compute dtype

    # ---- row tiling ---------------------------------------------------------
    m_pad = 0
    if M < sub:                              # tiny M: pad up to one sublane tile
        m_pad = sub - M
        xc = jnp.pad(xc, ((0, m_pad), (0, 0)))
    Me = M + m_pad
    tm_eff = max(sub, min(tm, (Me // sub) * sub))
    # Keep >= 2 row tiles when M allows so v7x's two TensorCores both get work
    # on the "parallel" axis (harmless on single-TC v5e/v6e).
    if _cdiv(Me, tm_eff) < 2 and Me > sub:
        tm_eff = max(sub, _round_up(_cdiv(Me, 2), sub))

    # ---- vocab tiling (lane-dense, multiple of 128; ragged tail in-kernel) ---
    v_pad = 0
    Veff = V
    if V < 128:                              # tiny V: pad to one lane tile
        v_pad = 128 - V
        Veff = 128
        wc = jnp.pad(wc, ((0, 0), (0, v_pad)))
        b2 = jnp.pad(b2, ((0, 0), (0, v_pad)), constant_values=_MASK)
    tv_eff = max(128, min(tv, (Veff // 128) * 128))
    nj = _cdiv(Veff, tv_eff)

    # ---- VMEM-aware shrink (double-buffered tiles + full-row logits scratch) -
    def vmem_est(tm_, tv_, nj_):
        return (2 * tm_ * D * cd             # x row tile (double-buffered)
                + 2 * D * tv_ * cd           # streamed weight tile
                + 2 * tv_ * 4                # bias tile
                + 2 * tm_ * tv_ * od         # output tile
                + nj_ * tm_ * tv_ * 4        # full-row logits scratch (single)
                + 2 * tm_ * 4)               # max / sum-exp accumulators

    cap = _vmem_capacity_bytes()
    budget = cap - 8 * 1024 * 1024           # leave headroom
    while vmem_est(tm_eff, tv_eff, nj) > budget and tm_eff > sub:
        tm_eff = max(sub, _round_up(tm_eff // 2, sub))
    while vmem_est(tm_eff, tv_eff, nj) > budget and tv_eff > 128:
        tv_eff = max(128, (tv_eff // 2 // 128) * 128)
        nj = _cdiv(Veff, tv_eff)

    vmem_limit = int(min(max(cap - 2 * 1024 * 1024, 16 * 1024 * 1024),
                         max(vmem_est(tm_eff, tv_eff, nj) + 4 * 1024 * 1024,
                             16 * 1024 * 1024)))

    grid = (_cdiv(Me, tm_eff), 2, nj)
    last_j = nj - 1

    out = pl.pallas_call(
        _make_kernel(Veff, tv_eff, nj),
        out_shape=jax.ShapeDtypeStruct((Me, Veff), out_dtype),
        grid_spec=pltpu.PrefetchScalarGridSpec(
            num_scalar_prefetch=0,
            grid=grid,
            in_specs=[
                # x row tile: fetched once per i, resident across the p/j sweep.
                # (Could be single-buffered via pipeline_mode to save VMEM.)
                pl.BlockSpec((tm_eff, D), lambda i, p, j: (i, 0)),
                # weight: streamed vocab tiles in pass 0; parked on the last
                # tile during pass 1 (no re-stream, no extra fetch).
                pl.BlockSpec((D, tv_eff),
                             lambda i, p, j: (0, j * (1 - p) + last_j * p)),
                # bias: matching (1, tv) vocab tile, parked the same way.
                pl.BlockSpec((1, tv_eff),
                             lambda i, p, j: (0, j * (1 - p) + last_j * p)),
            ],
            # pass 0 parks on block (i, 0) (never written there); pass 1 writes
            # lane-dense (i, j) tiles which are flushed on block change.
            out_specs=pl.BlockSpec((tm_eff, tv_eff), lambda i, p, j: (i, j * p)),
            scratch_shapes=[
                pltpu.VMEM((nj, tm_eff, tv_eff), jnp.float32),  # full-row logits
                pltpu.VMEM((tm_eff, 1), jnp.float32),           # running max
                pltpu.VMEM((tm_eff, 1), jnp.float32),           # running sum-exp
            ],
        ),
        compiler_params=pltpu.CompilerParams(
            dimension_semantics=("parallel", "arbitrary", "arbitrary"),
            vmem_limit_bytes=vmem_limit,
        ),
    )(xc, wc, b2)

    if m_pad or v_pad:
        out = out[:M, :V]
    return out.reshape(B, S, V)


def _reference(x, w, b):
    logits = jnp.einsum("bsd,dv->bsv", x, w) + b
    return jax.nn.log_softmax(logits, axis=-1)


if __name__ == "__main__":
    # Small shapes consistent with the module: batch=2, seq=8, d_model=32, vocab=128.
    B, S, D, V = 2, 8, 32, 128

    key = jax.random.PRNGKey(0)
    kx, kw, kb = jax.random.split(key, 3)

    x = jax.random.normal(kx, (B, S, D), dtype=jnp.float32)
    # Deterministic parameter init (uniform, matching nn.Linear's fan-in scaling).
    bound = 1.0 / (D ** 0.5)
    w = jax.random.uniform(kw, (D, V), dtype=jnp.float32, minval=-bound, maxval=bound)
    b = jax.random.uniform(kb, (V,), dtype=jnp.float32, minval=-bound, maxval=bound)

    ref = _reference(x, w, b)

    # Exact path (f32 matmul) validates the fused online-logsumexp logic tightly.
    out_f32 = jax.block_until_ready(projection_layer(x, w, b, compute_dtype=jnp.float32))
    assert out_f32.shape == (B, S, V)
    assert jnp.allclose(out_f32, ref, atol=1e-5, rtol=1e-5), "f32 path mismatch vs reference"
    assert jnp.allclose(jnp.sum(jnp.exp(out_f32), axis=-1), 1.0, atol=1e-5)

    # Multi vocab-tile path (tv forced to 128 -> 3 streamed tiles): exercises the
    # online max/logsumexp accumulation, the 3-D logits scratch and the parked
    # weight BlockSpec across several j steps.
    V2 = 384
    w2 = jax.random.uniform(kw, (D, V2), dtype=jnp.float32, minval=-bound, maxval=bound)
    b2 = jax.random.uniform(kb, (V2,), dtype=jnp.float32, minval=-bound, maxval=bound)
    ref2 = _reference(x, w2, b2)
    out2 = jax.block_until_ready(
        projection_layer(x, w2, b2, tv=128, compute_dtype=jnp.float32))
    assert out2.shape == (B, S, V2)
    assert jnp.allclose(out2, ref2, atol=1e-5, rtol=1e-5), "multi-tile path mismatch"

    # Performance path: bf16 MXU operands, f32 accumulation / softmax math.
    out_bf16 = jax.block_until_ready(projection_layer(x, w, b, compute_dtype=jnp.bfloat16))
    assert out_bf16.shape == (B, S, V)
    assert jnp.allclose(out_bf16, ref, atol=5e-2, rtol=5e-2), "bf16 path mismatch vs reference"
    assert jnp.allclose(jnp.sum(jnp.exp(out_bf16), axis=-1), 1.0, atol=1e-3)

    print("KERNEL_OK")
</pallas_src>

<mosaic_0001>
module attributes {stable_mosaic.version = 11 : i64} {
  func.func @kernel(%arg0: i32, %arg1: i32, %arg2: i32, %arg3: memref<8x32xf32, #tpu.memory_space<vmem>>, %arg4: memref<32x128xf32, #tpu.memory_space<vmem>>, %arg5: memref<1x128xf32, #tpu.memory_space<vmem>>, %arg6: memref<8x128xf32, #tpu.memory_space<vmem>>, %arg7: memref<1x8x128xf32, #tpu.memory_space<vmem>>, %arg8: memref<8x1xf32, #tpu.memory_space<vmem>>, %arg9: memref<8x1xf32, #tpu.memory_space<vmem>>) attributes {dimension_semantics = [#tpu.dimension_semantics<parallel>, #tpu.dimension_semantics<arbitrary>, #tpu.dimension_semantics<arbitrary>], iteration_bounds = array<i64: 2, 2, 1>, scalar_prefetch = 0 : i64, scratch_operands = 3 : i64, tpu.core_type = #tpu.core_type<tc>, window_params = [{transform_indices = @transform_0, window_bounds = array<i64: 8, 32>}, {transform_indices = @transform_1, window_bounds = array<i64: 32, 128>}, {transform_indices = @transform_2, window_bounds = array<i64: 1, 128>}, {transform_indices = @transform_3, window_bounds = array<i64: 8, 128>}]} {
    %c0_i32 = arith.constant 0 : i32
    %0 = arith.cmpi eq, %arg1, %c0_i32 : i32
    %c0_i32_0 = arith.constant 0 : i32
    %1 = arith.cmpi eq, %arg2, %c0_i32_0 : i32
    %2 = arith.andi %0, %1 : i1
    %3 = arith.extui %2 : i1 to i32
    %c0_i32_1 = arith.constant 0 : i32
    %4 = arith.cmpi ne, %3, %c0_i32_1 : i32
    scf.if %4 {
      %cst = arith.constant 0xFF800000 : f32
      %16 = vector.broadcast %cst : f32 to vector<8x1xf32>
      %c0 = arith.constant 0 : index
      %c0_8 = arith.constant 0 : index
      %17 = vector.load %arg8[%c0, %c0_8] : memref<8x1xf32, #tpu.memory_space<vmem>>, vector<8x1xf32>
      tpu.vector_store %arg8[%c0, %c0_8], %16 {strides = array<i32>} : memref<8x1xf32, #tpu.memory_space<vmem>>, vector<8x1xf32>,
      %cst_9 = arith.constant 0.000000e+00 : f32
      %18 = vector.broadcast %cst_9 : f32 to vector<8x1xf32>
      %c0_10 = arith.constant 0 : index
      %c0_11 = arith.constant 0 : index
      %19 = vector.load %arg9[%c0_10, %c0_11] : memref<8x1xf32, #tpu.memory_space<vmem>>, vector<8x1xf32>
      tpu.vector_store %arg9[%c0_10, %c0_11], %18 {strides = array<i32>} : memref<8x1xf32, #tpu.memory_space<vmem>>, vector<8x1xf32>,
    } else {
    }
    %c0_i32_2 = arith.constant 0 : i32
    %5 = arith.cmpi eq, %arg1, %c0_i32_2 : i32
    %6 = arith.extui %5 : i1 to i32
    %c0_i32_3 = arith.constant 0 : i32
    %7 = arith.cmpi ne, %6, %c0_i32_3 : i32
    scf.if %7 {
      %c0 = arith.constant 0 : index
      %c0_8 = arith.constant 0 : index
      %16 = vector.load %arg3[%c0, %c0_8] : memref<8x32xf32, #tpu.memory_space<vmem>>, vector<8x32xf32>
      %c0_9 = arith.constant 0 : index
      %c0_10 = arith.constant 0 : index
      %17 = vector.load %arg4[%c0_9, %c0_10] : memref<32x128xf32, #tpu.memory_space<vmem>>, vector<32x128xf32>
      %cst = arith.constant dense<0.000000e+00> : vector<8x128xf32>
      %18 = tpu.matmul %16, %17, %cst {dimension_numbers = #tpu.dot_dimension_numbers<[1], [0], [0], [1], [0, 0, 1, 1], [], []>} : vector<8x32xf32>, vector<32x128xf32>, vector<8x128xf32> -> vector<8x128xf32>
      %c0_11 = arith.constant 0 : index
      %c0_12 = arith.constant 0 : index
      %19 = vector.load %arg5[%c0_11, %c0_12] : memref<1x128xf32, #tpu.memory_space<vmem>>, vector<1x128xf32>
      %20 = vector.broadcast %19 : vector<1x128xf32> to vector<8x128xf32>
      %21 = arith.addf %18, %20 : vector<8x128xf32>
      %22 = arith.index_cast %arg2 : i32 to index
      %c0_13 = arith.constant 0 : index
      %c0_14 = arith.constant 0 : index
      %23 = vector.load %arg7[%22, %c0_13, %c0_14] : memref<1x8x128xf32, #tpu.memory_space<vmem>>, vector<1x8x128xf32>
      %24 = vector.shape_cast %23 : vector<1x8x128xf32> to vector<8x128xf32>
      %25 = vector.shape_cast %21 : vector<8x128xf32> to vector<1x8x128xf32>
      tpu.vector_store %arg7[%22, %c0_13, %c0_14], %25 {strides = array<i32>} : memref<1x8x128xf32, #tpu.memory_space<vmem>>, vector<1x8x128xf32>,
      %c0_15 = arith.constant 0 : index
      %c0_16 = arith.constant 0 : index
      %26 = vector.load %arg8[%c0_15, %c0_16] : memref<8x1xf32, #tpu.memory_space<vmem>>, vector<8x1xf32>
      %cst_17 = arith.constant dense<0xFF800000> : vector<8xf32>
      %27 = vector.multi_reduction <maximumf>, %21, %cst_17 [1] : vector<8x128xf32> to vector<8xf32>
      %28 = vector.shape_cast %27 : vector<8xf32> to vector<8x1xf32>
      %29 = arith.maximumf %26, %28 : vector<8x1xf32>
      %c0_18 = arith.constant 0 : index
      %c0_19 = arith.constant 0 : index
      %30 = vector.load %arg9[%c0_18, %c0_19] : memref<8x1xf32, #tpu.memory_space<vmem>>, vector<8x1xf32>
      %31 = arith.subf %26, %29 : vector<8x1xf32>
      %32 = math.exp %31 : vector<8x1xf32>
      %33 = arith.mulf %30, %32 : vector<8x1xf32>
      %34 = vector.broadcast %29 : vector<8x1xf32> to vector<8x128xf32>
      %35 = arith.subf %21, %34 : vector<8x128xf32>
      %36 = math.exp %35 : vector<8x128xf32>
      %cst_20 = arith.constant dense<0.000000e+00> : vector<8xf32>
      %37 = vector.multi_reduction <add>, %36, %cst_20 [1] : vector<8x128xf32> to vector<8xf32>
      %38 = vector.shape_cast %37 : vector<8xf32> to vector<8x1xf32>
      %39 = arith.addf %33, %38 : vector<8x1xf32>
      %c0_21 = arith.constant 0 : index
      %c0_22 = arith.constant 0 : index
      %40 = vector.load %arg9[%c0_21, %c0_22] : memref<8x1xf32, #tpu.memory_space<vmem>>, vector<8x1xf32>
      tpu.vector_store %arg9[%c0_21, %c0_22], %39 {strides = array<i32>} : memref<8x1xf32, #tpu.memory_space<vmem>>, vector<8x1xf32>,
      %c0_23 = arith.constant 0 : index
      %c0_24 = arith.constant 0 : index
      %41 = vector.load %arg8[%c0_23, %c0_24] : memref<8x1xf32, #tpu.memory_space<vmem>>, vector<8x1xf32>
      tpu.vector_store %arg8[%c0_23, %c0_24], %29 {strides = array<i32>} : memref<8x1xf32, #tpu.memory_space<vmem>>, vector<8x1xf32>,
    } else {
    }
    %c1_i32 = arith.constant 1 : i32
    %8 = arith.cmpi eq, %arg1, %c1_i32 : i32
    %c0_i32_4 = arith.constant 0 : i32
    %9 = arith.cmpi eq, %arg2, %c0_i32_4 : i32
    %10 = arith.andi %8, %9 : i1
    %11 = arith.extui %10 : i1 to i32
    %c0_i32_5 = arith.constant 0 : i32
    %12 = arith.cmpi ne, %11, %c0_i32_5 : i32
    scf.if %12 {
      %c0 = arith.constant 0 : index
      %c0_8 = arith.constant 0 : index
      %16 = vector.load %arg8[%c0, %c0_8] : memref<8x1xf32, #tpu.memory_space<vmem>>, vector<8x1xf32>
      %c0_9 = arith.constant 0 : index
      %c0_10 = arith.constant 0 : index
      %17 = vector.load %arg9[%c0_9, %c0_10] : memref<8x1xf32, #tpu.memory_space<vmem>>, vector<8x1xf32>
      %18 = math.log %17 : vector<8x1xf32>
      %19 = arith.addf %16, %18 : vector<8x1xf32>
      %c0_11 = arith.constant 0 : index
      %c0_12 = arith.constant 0 : index
      %20 = vector.load %arg8[%c0_11, %c0_12] : memref<8x1xf32, #tpu.memory_space<vmem>>, vector<8x1xf32>
      tpu.vector_store %arg8[%c0_11, %c0_12], %19 {strides = array<i32>} : memref<8x1xf32, #tpu.memory_space<vmem>>, vector<8x1xf32>,
    } else {
    }
    %c1_i32_6 = arith.constant 1 : i32
    %13 = arith.cmpi eq, %arg1, %c1_i32_6 : i32
    %14 = arith.extui %13 : i1 to i32
    %c0_i32_7 = arith.constant 0 : i32
    %15 = arith.cmpi ne, %14, %c0_i32_7 : i32
    scf.if %15 {
      %16 = arith.index_cast %arg2 : i32 to index
      %c0 = arith.constant 0 : index
      %c0_8 = arith.constant 0 : index
      %17 = vector.load %arg7[%16, %c0, %c0_8] : memref<1x8x128xf32, #tpu.memory_space<vmem>>, vector<1x8x128xf32>
      %18 = vector.shape_cast %17 : vector<1x8x128xf32> to vector<8x128xf32>
      %c0_9 = arith.constant 0 : index
      %c0_10 = arith.constant 0 : index
      %19 = vector.load %arg8[%c0_9, %c0_10] : memref<8x1xf32, #tpu.memory_space<vmem>>, vector<8x1xf32>
      %20 = vector.broadcast %19 : vector<8x1xf32> to vector<8x128xf32>
      %21 = arith.subf %18, %20 : vector<8x128xf32>
      %c0_11 = arith.constant 0 : index
      %c0_12 = arith.constant 0 : index
      %22 = vector.load %arg6[%c0_11, %c0_12] : memref<8x128xf32, #tpu.memory_space<vmem>>, vector<8x128xf32>
      tpu.vector_store %arg6[%c0_11, %c0_12], %21 {strides = array<i32>} : memref<8x128xf32, #tpu.memory_space<vmem>>, vector<8x128xf32>,
    } else {
    }
    return
  }
  func.func @transform_0(%arg0: i32, %arg1: i32, %arg2: i32) -> (i32, i32) {
    %c0_i32 = arith.constant 0 : i32
    %c0_i32_0 = arith.constant 0 : i32
    return %arg0, %c0_i32 : i32, i32
  }
  func.func @transform_1(%arg0: i32, %arg1: i32, %arg2: i32) -> (i32, i32) {
    %c1_i32 = arith.constant 1 : i32
    %0 = arith.subi %c1_i32, %arg1 : i32
    %1 = arith.muli %arg2, %0 : i32
    %c0_i32 = arith.constant 0 : i32
    %2 = arith.muli %c0_i32, %arg1 : i32
    %3 = arith.addi %1, %2 : i32
    %c0_i32_0 = arith.constant 0 : i32
    %c0_i32_1 = arith.constant 0 : i32
    return %c0_i32_0, %3 : i32, i32
  }
  func.func @transform_2(%arg0: i32, %arg1: i32, %arg2: i32) -> (i32, i32) {
    %c1_i32 = arith.constant 1 : i32
    %0 = arith.subi %c1_i32, %arg1 : i32
    %1 = arith.muli %arg2, %0 : i32
    %c0_i32 = arith.constant 0 : i32
    %2 = arith.muli %c0_i32, %arg1 : i32
    %3 = arith.addi %1, %2 : i32
    %c0_i32_0 = arith.constant 0 : i32
    %c0_i32_1 = arith.constant 0 : i32
    return %c0_i32_0, %3 : i32, i32
  }
  func.func @transform_3(%arg0: i32, %arg1: i32, %arg2: i32) -> (i32, i32) {
    %0 = arith.muli %arg2, %arg1 : i32
    %c0_i32 = arith.constant 0 : i32
    return %arg0, %0 : i32, i32
  }
}

</mosaic_0001>

<bundles_post_ra>
// kernel: tpu_custom_call.1
= control target key start
LH: loop header
LB: loop body
LE: loop exit
PB: predicated region body
PF: predicated region fallthrough
CT: control target
= control target key end

     0   :  { %8 = vsyncpa [#allocation6], 0  ;;  %s1103_s0 = inlined_call_operand.hbm [shape: f32[16,32], index: 0, kind: input, shape index: {}]   ;;  %s1104_s1 = inlined_call_operand.hbm [shape: f32[32,128], index: 1, kind: input, shape index: {}]   ;;  %s1105_s2 = inlined_call_operand.vmem [shape: f32[1,128], index: 2, kind: input, shape index: {}]   ;;  %s1106_s3 = inlined_call_operand.hbm [shape: f32[16,128], index: 3, kind: output, shape index: {}]  }
   0x1   :  { %10 = vsyncpa [#allocation6 + $0x1], 0 }
   0x2   :  { %11 = vsyncpa [#allocation9], 0 }
   0x3   :  { %13 = vsyncpa [#allocation9 + $0x1], 0 }
   0x4   :  { %14 = vsyncpa [#allocation7], 0 }
   0x5   :  { %16 = vsyncpa [#allocation7 + $0x1], 0  ;;  %s903_s12 = smov 0   ;;  %s905_s13 = smov 0  }
   0x6   :  { %s907_s14 = smov 0   ;;  %s909_s15 = smov 0  }
   0x7   :  { %s911_s16 = smov 0   ;;  %s913_s17 = smov 0  }
   0x8   :  { %s915_s18 = smov 0   ;;  %s917_s19 = smov 0  }
   0x9 LB: > { %s572_s20 = sadd.s32 4294967295, %s870_s19   ;;  %s573_s21 = sadd.s32 4294967294, %s870_s19   ;;  %s870_s19 = sphi %s917_s19, %s22_s19   ;;  %s866_s18 = sphi %s915_s18, %s1128_s18   ;;  %s862_s17 = sphi %s913_s17, %s1127_s17   ;;  %s858_s16 = sphi %s911_s16, %s1126_s16   ;;  %s854_s15 = sphi %s909_s15, %s1125_s15   ;;  %s850_s14 = sphi %s907_s14, %s1124_s14   ;;  %s846_s13 = sphi %s905_s13, %s1123_s13   ;;  %s842_s12 = sphi %s903_s12, %s1122_s12  }
   0xa   : > { %s37_s22 = sadd.s32 1, %s862_s17  ;;  %s41_s23 = sadd.s32 1, %s866_s18 }
   0xb   : > { %p39_p0 = scmp.ge.s32.totalorder %s37_s22, 2  ;;  %s48_s24 = sadd.s32 1, %s850_s14 }
   0xc   : > { %p55_p1 = scmp.ne.s32.totalorder %s850_s14, %s846_s13  ;;  %p1107_p2 = scmp.eq.s32.totalorder %s870_s19, 0 }
   0xd   : > { %s1130_s22 = smov (%p39_p0, %s37_s22), 0  ;;  %s1132_s23 = smov (!%p39_p0, %s41_s23), %s866_s18 }
   0xe   : > { %p956_p3 = por %p1107_p2, %p55_p1  ;;  %p61_p4 = scmp.ne.s32.totalorder %s846_s13, %s842_s12 }
   0xf   : > { %p43_p5 = scmp.ge.s32.totalorder %s1132_s23, 2  ;;  %p962_p6 = scmp.eq.s32.totalorder %s572_s20, 0 }
  0x10   : > { %p149_p7 = scmp.eq.s32.totalorder %s572_s20, 3  ;;  %p155_p8 = scmp.eq.s32.totalorder %s573_s21, 3 }
  0x11   : > { %s1134_s23 = smov (%p43_p5, %s1132_s23), 0  ;;  %p970_p9 = por %p962_p6, %p61_p4 }
  0x12   : > { %p974_p10 = por %p149_p7, %p55_p1  ;;  %s45_s29 = ssub.s32 %s866_s18, %s1134_s23 }
  0x13   : > { %p980_p11 = por %p155_p8, %p61_p4  ;;  %p46_p12 = scmp.eq.s32.totalorder %s45_s29, 0 }
  0x14   : > { %s1113_s28 = scalar_select %p974_p10, 1, 0 }
  0x15   : > { %s1114_s30 = scalar_select %p980_p11, 1, 0 }
  0x16   : > { %p1108_p13 = scmp.lt.s32.totalorder %s870_s19, 4  ;;  %s175_s4 = sand.u32 1, %s850_s14  }
  0x17   : > { %s987_s5 = scalar_select %p46_p12, %s850_s14, %s48_s24  }
  0x18   : > { %s576_s6 = sshll.u32 %s175_s4, 3  ;;  %s577_s7 = sshll.u32 %s866_s18, 7 }
  0x19   : > { %s184_s10 = scalar_lea.hbm %s1103_s0, %s577_s7  ;;  %s179_s11 = scalar_lea.vmem [#allocation5], %s576_s6 }
  0x1a   : > { %s186_s20 = sshll.u32 %s179_s11, 4  ;;  %p997_p0 = pnand %p1108_p13, %p956_p3  ;;  %s187_s20 = int_to_ptr.vmem [resolvable:$true] %s186_s20 }
  0x1b   : > { %p580_p1 = scmp.ge.s32.totalorder %s870_s19, 1  ;;  %p223_p4 = scmp.lt.s32.totalorder %s870_s19, 5 }
  0x1c   : > { %s176_s24 = scalar_lea.sflag [#allocation6], %s175_s4  ;;  %p718_p5 = pneg %p997_p0 }
  0x1d   : > { %s729_s29 = scalar_lea.vmem %s187_s20, 128  ;;  %s872_s7 = smov [#allocation5]  }
  0x1e   : > { %p730_p7 = scmp.ne.s32.totalorder %s187_s20, %s729_s29  ;;  %s734_s6 = sshll.u32 %s872_s7, 4  ;;  %s735_s6 = int_to_ptr.vmem [resolvable:$false] %s734_s6 }
  0x1f   : > { %s736_s8 = scalar_lea.vmem %s735_s6, 256  ;;  %p737_p2 = scmp.lt.s32.totalorder %s187_s20, %s735_s6 }
  0x20   : > { %p732_p8 = pnand %p730_p7, %p718_p5  ;;  %p738_p11 = scmp.lt.s32.totalorder %s736_s8, %s729_s29 }
  0x22   : > { %p733_p12 = pneg %p732_p8  ;;  %p739_p3 = por %p738_p11, %p737_p2 }
  0x24   : > { %p740_p13 = pnand %p739_p3, %p733_p12 }
  0x26   : > { %743 = shalt.err (!%p740_p13)
}
  0x27   : > { %623 = dma.hbm_to_vmem [thread:$0]  (!%p997_p0), %s184_s10, 128, %s187_s20, %s176_s24  }
  0x28   : > { %p1011_p5 = pnand %p580_p1, %p223_p4  ;;  %s873_s4 = smov [#allocation8]  }
  0x29   : > { %s205_s9 = sshll.u32 %s873_s4, 4  ;;  %p1117_p7 = scmp.eq.s32.totalorder %s870_s19, 0  ;;  %s206_s9 = int_to_ptr.vmem [resolvable:$true] %s205_s9 }
  0x2a   : > { %p1118_p8 = scmp.lt.s32.totalorder %s870_s19, 4  ;;  %s755_s21 = scalar_lea.vmem %s206_s9, 512 }
  0x2b   : > { %p756_p13 = scmp.ne.s32.totalorder %s206_s9, %s755_s21  ;;  %s762_s10 = scalar_lea.vmem %s206_s9, 1024 }
  0x2c   : > { %p1019_p2 = pnand %p1118_p8, %p1117_p7  ;;  %p763_p1 = scmp.lt.s32.totalorder %s206_s9, %s206_s9 }
  0x2d   : > { %p764_p4 = scmp.lt.s32.totalorder %s762_s10, %s755_s21 }
  0x2e   : > { %p746_p11 = pneg %p1019_p2 }
  0x2f   : > { %p765_p3 = por %p764_p4, %p763_p1 }
  0x30   : > { %p758_p0 = pnand %p756_p13, %p746_p11 }
  0x32   : > { %p759_p12 = pneg %p758_p0 }
  0x34   : > { %p766_p10 = pnand %p765_p3, %p759_p12 }
  0x36   : > { %769 = shalt.err (!%p766_p10)
}
  0x37   : > { %s874_s20 = smov 128   ;;  %s875_s24 = smov 8  }
  0x38   : > { %626 = dma.hbm_to_vmem [thread:$0]  (!%p1019_p2), %s1104_s1, 512, %s206_s9, [#allocation9], %s874_s20, %s874_s20, %s875_s24  }
  0x39   : > { %227 = sbr.rel (%p1011_p5) target bundleno = 892 (0x37c), region = 32  ;;  %s1033_s6 = sand.u32 (!%p1011_p5), 1, %s846_s13  }
  0x3a   : > { %s581_s8 = sshll.u32 (!%p1011_p5), %s1033_s6, 3  ;;  %s230_s4 = scalar_lea.sflag (!%p1011_p5), [#allocation6], %s1033_s6 }
  0x3b   : > { %s233_s21 = scalar_lea.vmem (!%p1011_p5), [#allocation5], %s581_s8 }
  0x3e   : > { %829 = dma.done.wait (%p970_p9), %s230_s4, 128  }
  0x3f   : > { %831 = vsyncadd (%p970_p9), %s230_s4, 4294967168 }
  0x40   : > { %833 = dma.done.wait (%p962_p6), [#allocation9], 512  }
  0x41   : > { %835 = vsyncadd (%p962_p6), [#allocation9], 4294966784  ;;  %p285_p10 = scmp.eq.s32.totalorder %s854_s15, 0  ;;  %s1046_s25 = scalar_lea.vmem [#allocation10], %s581_s8 }
  0x42   : > { %vm291_vm0 = vcmask (%p285_p10), 7168   ;;  %v876_v0 = vmov (%p285_p10), -inf   ;;  %v877_v1 = vmov (%p285_p10), 0.0  }
  0x43   : > { %290 = sbr.rel (!%p285_p10) target bundleno = 72 (0x48), region = 44  ;;  %292 = vst.msk [vmem:[#allocation3] sm:$0xff] (%p285_p10), %vm291_vm0, %v876_v0  ;;  %293 = vst.msk [vmem:[#allocation4] sm:$0xff] (%p285_p10), %vm291_vm0, %v877_v1 }
  0x48 PF: > { %p585_p5 = scmp.ne.s32.totalorder %s854_s15, 0 }
  0x4a   : > { %296 = sbr.rel (%p585_p5) target bundleno = 706 (0x2c2), region = 48 }
  0x4f   : > { %v301_v2 = vld [vmem:[#allocation8 + $0x18] sm:$0xff]  ;;  %v878_v3 = vmov 0.0   ;;  %v300_v4 = vld [vmem:[#allocation8 + $0x10] sm:$0xff]  ;;  %vm879_vm1 = vmmov 0   ;;  %v299_v5 = vld [vmem:[#allocation8 + $0x8] sm:$0xff]  ;;  %vm309_vm2 = vcmask 261120  }
  0x50   : > { %601 = vmatprep.subr.mxu0 %v878_v3  ;;  %609 = vmatprep.mubr.msk.f32.mxu0 %vm879_vm1, %v878_v3  ;;  %v298_v6 = vld [vmem:[#allocation8] sm:$0xff]  ;;  %v297_v7 = vld [vmem:[%s233_s21] sm:$0xff]  ;;  %v880_v12 = vmov 0   ;;  %vm406_vm3 = vcmask 7168   ;;  %v390_v23 = vld [vmem:[#allocation4] sm:$0xff] }
  0x51   : > { %602 = vmatpush3.msra.mxu0 %v301_v2  ;;  %v586_v8 = vld [vmem:[%s1105_s2] ss:$0 sm:$0xff]  ;;  %708 = vset.pattern.permute.xlu0 %v880_v12  ;;  %v386_v13 = vld [vmem:[#allocation3] sm:$0xff] }
  0x52   : > { %603 = vmatprep.subr.mxu0 %v878_v3 }
  0x53   : > { %604 = vmatpush3.msra.mxu0 %v300_v4 }
  0x54   : > { %605 = vmatprep.subr.mxu0 %v878_v3 }
  0x55   : > { %606 = vmatpush3.msra.mxu0 %v299_v5 }
  0x56   : > { %607 = vmatprep.subr.mxu0 %v878_v3 }
  0x57   : > { %608 = vmatpush3.msra.mxu0 %v298_v6 }
  0x58   : > { %610 = vmatmul.mubr.msk.f32.vlgmr.msra.gmra.mxu0 %vm309_vm2, %v297_v7 }
 0x118   : > { %v379_v9 = vpop.f32.mrf.mxu0 }
 0x119   : > { %v380_v10 = vadd.f32 %v586_v8, %v379_v9 }
 0x11a   : > { %v611_v11 = vpop.f32.mrf.mxu0 }
 0x11b   : > { %385 = vst [vmem:[#allocation2] sm:$0xff] %v380_v10  ;;  %387 = vmax.xlane.f32.xlu0 %v380_v10 }
 0x1a4   : > { %v388_v14 = vpop.xlane.xlu0 %387 }
 0x1a5   : > { %v389_v15 = vmax.f32 %v386_v13, %v388_v14 }
 0x1a7   : > { %v391_v16 = vsub.f32 %v386_v13, %v389_v15  ;;  %408 = vst.msk [vmem:[#allocation3] sm:$0xff] %vm406_vm3, %v389_v15  ;;  %397 = vperm.xlu0 %708, %v389_v15  }
 0x1a9   : > { %v392_v21 = vmul.f32 1.442695, %v391_v16 }
 0x222   : > { %v398_v17 = vpop.permute.xlu0 %397 }
 0x223   : > { %v400_v18 = vsub.f32 %v380_v10, %v398_v17 }
 0x225   : > { %v401_v19 = vmul.f32 1.442695, %v400_v18 }
 0x227   : > { %709 = vpow2.f32 %v401_v19 }
 0x228   : > { %711 = vpow2.f32 %v392_v21 }
 0x234   : > { %v710_v20 = vpop.eup %709 }
 0x235   : > { %403 = vadd.xlane.f32.xlu1 %v710_v20  ;;  %v712_v22 = vpop.eup %711 }
 0x236   : > { %v394_v24 = vmul.f32 %v712_v22, %v390_v23 }
 0x2be   : > { %v404_v25 = vpop.xlane.xlu1 %403 }
 0x2bf   : > { %v405_v26 = vadd.f32 %v404_v25, %v394_v24 }
 0x2c1   : > { %407 = vst.msk [vmem:[#allocation4] sm:$0xff] %vm406_vm3, %v405_v26 }
 0x2c2 PF: > { %p409_p6 = scmp.eq.s32.totalorder %s854_s15, 1 }
 0x2c3   : > { %v414_v29 = vld [vmem:[#allocation3] sm:$0xff] (%p409_p6)  ;;  %vm419_vm4 = vcmask (%p409_p6), 7168  }
 0x2c4   : > { %413 = sbr.rel (!%p409_p6) target bundleno = 732 (0x2dc), region = 52 }
 0x2c8   : > { %v415_v27 = vld [vmem:[#allocation4] sm:$0xff] (%p409_p6) }
 0x2c9   : > { %713 = vlog2.f32 %v415_v27 }
 0x2d6   : > { %v714_v28 = vpop.eup %713 }
 0x2d7   : > { %v417_v30 = vmul.f32 0.6931472, %v714_v28 }
 0x2d9   : > { %v418_v31 = vadd.f32 %v417_v30, %v414_v29 }
 0x2db   : > { %420 = vst.msk [vmem:[#allocation3] sm:$0xff] %vm419_vm4, %v418_v31 }
 0x2dc PF: > { %p589_p9 = scmp.ne.s32.totalorder %s854_s15, 1 }
 0x2de   : > { %423 = sbr.rel (%p589_p9) target bundleno = 868 (0x364), region = 56 }
 0x2e3   : > { %v427_v32 = vld [vmem:[#allocation3] sm:$0xff]  ;;  %v881_v33 = vmov 0   ;;  %v426_v34 = vld [vmem:[#allocation2] sm:$0xff] }
 0x2e4   : > { %715 = vset.pattern.permute.xlu0 %v881_v33 }
 0x2e5   : > { %430 = vperm.xlu0 %715, %v427_v32  }
 0x360   : > { %v431_v35 = vpop.permute.xlu0 %430 }
 0x361   : > { %v433_v36 = vsub.f32 %v426_v34, %v431_v35 }
 0x363   : > { %434 = vst [vmem:[%s1046_s25] sm:$0xff] %v433_v36 }
 0x364 PF: > { %s591_s9 = sshll.u32 %s858_s16, 7  ;;  %s451_s20 = sshll.u32 %s1046_s25, 4  ;;  %s452_s20 = int_to_ptr.vmem [resolvable:$true] %s451_s20 }
 0x365   : > { %s449_s15 = scalar_lea.hbm %s1106_s3, %s591_s9  ;;  %s436_s24 = scalar_lea.sflag [#allocation7], %s1033_s6 }
 0x366   : > { %s770_s29 = scalar_lea.vmem %s452_s20, 128  ;;  %p1120_p8 = scmp.ne.s32.totalorder %s1113_s28, 0 }
 0x367   : > { %p771_p7 = scmp.ne.s32.totalorder %s452_s20, %s770_s29  ;;  %s882_s7 = smov [#allocation10]  }
 0x368   : > { %s774_s8 = sshll.u32 %s882_s7, 4  ;;  %s775_s8 = int_to_ptr.vmem [resolvable:$false] %s774_s8 }
 0x369   : > { %p772_p2 = pnand %p771_p7, %p1120_p8  ;;  %s776_s4 = scalar_lea.vmem %s775_s8, 256 }
 0x36a   : > { %p777_p13 = scmp.lt.s32.totalorder %s452_s20, %s775_s8  ;;  %p778_p0 = scmp.lt.s32.totalorder %s776_s4, %s770_s29 }
 0x36b   : > { %p773_p11 = pneg %p772_p2 }
 0x36c   : > { %p779_p12 = por %p778_p0, %p777_p13 }
 0x36e   : > { %p780_p1 = pnand %p779_p12, %p773_p11 }
 0x370   : > { %783 = shalt.err (!%p780_p1)
}
 0x371   : > { %s784_s16 = scalar_lea.hbm %s449_s15, 128  ;;  %s788_s25 = scalar_lea.hbm %s1106_s3, 256 }
 0x372   : > { %p785_p4 = scmp.ne.s32.totalorder %s449_s15, %s784_s16  ;;  %p789_p5 = scmp.lt.s32.totalorder %s449_s15, %s1106_s3 }
 0x373   : > { %p790_p6 = scmp.lt.s32.totalorder %s788_s25, %s784_s16 }
 0x374   : > { %p786_p3 = pnand %p785_p4, %p1120_p8 }
 0x375   : > { %p791_p9 = por %p790_p6, %p789_p5 }
 0x376   : > { %p787_p10 = pneg %p786_p3 }
 0x378   : > { %p792_p7 = pnand %p791_p9, %p787_p10 }
 0x37a   : > { %795 = shalt.err (!%p792_p7)
}
 0x37b   : > { %618 = dma.vmem_to_hbm [thread:$0]  (%p1120_p8), %s452_s20, 128, %s449_s15, %s436_s24  }
 0x37c PF: > { %p634_p2 = scmp.ge.s32.totalorder %s870_s19, 2  ;;  %s463_s9 = sand.u32 1, %s842_s12  }
 0x37d   : > { %p1121_p11 = scmp.ne.s32.totalorder %s1114_s30, 0  ;;  %s464_s11 = scalar_lea.sflag [#allocation7], %s463_s9 }
 0x37f   : > { %p628_p13 = pnand %p634_p2, %p1121_p11 }
 0x381   : > { %p629_p0 = pneg %p628_p13 }
 0x383   : > { %837 = dma.done.wait (%p629_p0), %s464_s11, 128  }
 0x384   : > { %839 = vsyncadd (%p629_p0), %s464_s11, 4294967168  ;;  %s22_s19 = sadd.s32 1, %s870_s19   ;;  %s1122_s12 = smov %s846_s13 }
 0x385   : > { %p19_p12 = scmp.ge.s32.totalorder %s22_s19, 6   ;;  %s1123_s13 = smov %s850_s14 }
 0x386   : > { %s1124_s14 = smov %s987_s5  ;;  %s1125_s15 = smov %s862_s17 }
 0x387   : > { %s1126_s16 = smov %s866_s18  ;;  %s1127_s17 = smov %s1130_s22 }
 0x388   : > { %s1128_s18 = smov %s1134_s23  ;;  %21 = sbr.rel (!%p19_p12) target bundleno = 9 (0x9), region = 111 }
 0x38d   :  { %469 = vsyncpa [#allocation6], 1 }
 0x38e   :  { %471 = vsyncpa [#allocation6 + $0x1], 1 }
 0x38f   :  { %472 = vsyncpa [#allocation9], 1 }
 0x390   :  { %474 = vsyncpa [#allocation9 + $0x1], 1 }
 0x391   :  { %475 = vsyncpa [#allocation7], 1 }
 0x392   :  { %477 = vsyncpa [#allocation7 + $0x1], 1 }

</bundles_post_ra>
